<compile_context>
chip_gen: v5e
topology: v5e:2x2
jax: 0.10.0
libtpu: 0.0.40
codegen_flags: <defaults>
</compile_context>

<pallas_src>
import functools

import jax
import jax.numpy as jnp
from jax.experimental import pallas as pl
from jax.experimental.pallas import tpu as pltpu

IN_FEATURES = 2
OUT_FEATURES = 3
LANES = 128
SUBLANES = 8


def _emittion_kernel(z_ref, w_ref, b_ref, o_ref):
    # z_ref: (2, R, 128) VMEM  -- feature-major, sublane/lane-dense
    # w_ref: (6,)        SMEM  -- nn.Linear.weight flattened row-major:
    #                             W[j, k] == w_ref[2*j + k]
    # b_ref: (3,)        SMEM
    # o_ref: (3, R, 128) VMEM  -- feature-major output
    z0 = z_ref[0]  # (R, 128)
    z1 = z_ref[1]  # (R, 128)
    # Static unroll over the 3 output features: pure VPU scalar-splat FMAs,
    # full-vreg dense loads and stores.
    for j in range(OUT_FEATURES):
        o_ref[j] = w_ref[2 * j] * z0 + w_ref[2 * j + 1] * z1 + b_ref[j]


def _round_up(x, m):
    return ((x + m - 1) // m) * m


def _cdiv(a, b):
    return -(-a // b)


@functools.partial(jax.jit, static_argnames=("max_tile",))
def emittion_forward(z, weight, bias, *, max_tile=131072):
    """z: (N, 2) f32, weight: (3, 2) f32, bias: (3,) f32 -> (N, 3) f32."""
    n = z.shape[0]

    # Max batch-rows per grid step; keep it a multiple of 8*128 so multi-step
    # blocks stay sublane- and lane-aligned (avoids the (8,128) constraint
    # failure flagged in review).
    blk_unit = SUBLANES * LANES  # 1024
    max_tile = max(blk_unit, (max_tile // blk_unit) * blk_unit)

    n_128 = _round_up(n, LANES)

    if n_128 > max_tile // 2:
        # Big batch: pick the step count first (>= 2 so v7x megacore can
        # split the batch across both TensorCores), then derive the tile so
        # the final step is never a nearly-empty padded tile.
        steps = max(2, _cdiv(n_128, max_tile))
        tile = _round_up(_cdiv(n_128, steps), blk_unit)
    else:
        # Small/medium batch: a single block equal to the full (padded)
        # array; per-step overhead would dominate any further split.
        steps = 1
        tile = n_128
    n_pad = steps * tile
    rows_blk = tile // LANES   # sublane-blocks per grid step
    rows_all = n_pad // LANES

    # Feature-major, sublane/lane-dense presentation: (2, n_pad//128, 128)
    # with z_t[f, r, l] == z[r*128 + l, f].  Padded tail lanes are zeros,
    # evaluate to `bias` in the kernel, and are sliced off below.
    # TODO(synk): in a fused pipeline, keep the (feature, batch) layout in
    # the producer/consumer (or fuse this linear as an epilogue) instead of
    # paying these wrapper layout passes over HBM.
    z_pad = jnp.zeros((n_pad, IN_FEATURES), jnp.float32).at[:n, :].set(
        z.astype(jnp.float32)
    )
    z_t = z_pad.T.reshape(IN_FEATURES, rows_all, LANES)
    w_flat = weight.astype(jnp.float32).reshape(-1)  # (6,)
    b = bias.astype(jnp.float32)                     # (3,)

    out_t = pl.pallas_call(
        _emittion_kernel,
        out_shape=jax.ShapeDtypeStruct(
            (OUT_FEATURES, rows_all, LANES), jnp.float32
        ),
        grid_spec=pltpu.PrefetchScalarGridSpec(
            num_scalar_prefetch=0,
            grid=(steps,),
            in_specs=[
                # Dense batch-row tile stream of z (default double-buffered).
                pl.BlockSpec(
                    (IN_FEATURES, rows_blk, LANES), lambda i: (0, i, 0)
                ),
                # Weights and bias are resident SMEM scalars.
                pl.BlockSpec(memory_space=pltpu.MemorySpace.SMEM),
                pl.BlockSpec(memory_space=pltpu.MemorySpace.SMEM),
            ],
            out_specs=pl.BlockSpec(
                (OUT_FEATURES, rows_blk, LANES), lambda i: (0, i, 0)
            ),
        ),
        compiler_params=pltpu.CompilerParams(
            dimension_semantics=("parallel",),
        ),
    )(z_t, w_flat, b)

    return out_t.reshape(OUT_FEATURES, n_pad)[:, :n].T


def init_params(key):
    """Deterministic init matching nn.Linear(2, 3) parameter shapes.

    PyTorch default: U(-1/sqrt(in_features), 1/sqrt(in_features)).
    """
    k_w, k_b = jax.random.split(key)
    bound = 1.0 / jnp.sqrt(IN_FEATURES)
    weight = jax.random.uniform(
        k_w, (OUT_FEATURES, IN_FEATURES), jnp.float32, -bound, bound
    )
    bias = jax.random.uniform(
        k_b, (OUT_FEATURES,), jnp.float32, -bound, bound
    )
    return weight, bias


if __name__ == "__main__":
    key = jax.random.PRNGKey(0)
    k_params, k_z1, k_z2 = jax.random.split(key, 3)

    weight, bias = init_params(k_params)

    # Small batch of latent vectors z, each of dim 2 (matches module spec).
    z_small = jax.random.normal(k_z1, (8, 2), jnp.float32)
    mean_small = emittion_forward(z_small, weight, bias)
    jax.block_until_ready(mean_small)
    ref_small = z_small @ weight.T + bias
    assert mean_small.shape == (8, OUT_FEATURES)
    assert jnp.allclose(mean_small, ref_small, atol=1e-5, rtol=1e-5)

    # Second check: batch not a multiple of 128 (exercises padding path).
    z_mid = jax.random.normal(k_z2, (300, 2), jnp.float32)
    mean_mid = emittion_forward(z_mid, weight, bias)
    jax.block_until_ready(mean_mid)
    ref_mid = z_mid @ weight.T + bias
    assert mean_mid.shape == (300, OUT_FEATURES)
    assert jnp.allclose(mean_mid, ref_mid, atol=1e-5, rtol=1e-5)

    print("KERNEL_OK")
</pallas_src>

<mosaic_0001>
module attributes {stable_mosaic.version = 11 : i64} {
  func.func @_emittion_kernel(%arg0: i32, %arg1: memref<2x1x128xf32, #tpu.memory_space<vmem>>, %arg2: memref<6xf32, #tpu.memory_space<smem>>, %arg3: memref<3xf32, #tpu.memory_space<smem>>, %arg4: memref<3x1x128xf32, #tpu.memory_space<vmem>>) attributes {dimension_semantics = [#tpu.dimension_semantics<parallel>], iteration_bounds = array<i64: 1>, scalar_prefetch = 0 : i64, scratch_operands = 0 : i64, tpu.core_type = #tpu.core_type<tc>, window_params = [{transform_indices = @transform_0, window_bounds = array<i64: 2, 1, 128>}, {transform_indices = @transform_1, window_bounds = array<i64: 6>}, {transform_indices = @transform_2, window_bounds = array<i64: 3>}, {transform_indices = @transform_3, window_bounds = array<i64: 3, 1, 128>}]} {
    %c0 = arith.constant 0 : index
    %c0_0 = arith.constant 0 : index
    %c0_1 = arith.constant 0 : index
    %0 = vector.load %arg1[%c0, %c0_0, %c0_1] : memref<2x1x128xf32, #tpu.memory_space<vmem>>, vector<1x1x128xf32>
    %1 = vector.shape_cast %0 : vector<1x1x128xf32> to vector<1x128xf32>
    %c1 = arith.constant 1 : index
    %c0_2 = arith.constant 0 : index
    %c0_3 = arith.constant 0 : index
    %2 = vector.load %arg1[%c1, %c0_2, %c0_3] : memref<2x1x128xf32, #tpu.memory_space<vmem>>, vector<1x1x128xf32>
    %3 = vector.shape_cast %2 : vector<1x1x128xf32> to vector<1x128xf32>
    %c0_4 = arith.constant 0 : index
    %4 = memref.load %arg2[%c0_4] : memref<6xf32, #tpu.memory_space<smem>>
    %5 = vector.broadcast %4 : f32 to vector<1x128xf32>
    %6 = arith.mulf %5, %1 : vector<1x128xf32>
    %c1_5 = arith.constant 1 : index
    %7 = memref.load %arg2[%c1_5] : memref<6xf32, #tpu.memory_space<smem>>
    %8 = vector.broadcast %7 : f32 to vector<1x128xf32>
    %9 = arith.mulf %8, %3 : vector<1x128xf32>
    %10 = arith.addf %6, %9 : vector<1x128xf32>
    %c0_6 = arith.constant 0 : index
    %11 = memref.load %arg3[%c0_6] : memref<3xf32, #tpu.memory_space<smem>>
    %12 = vector.broadcast %11 : f32 to vector<1x128xf32>
    %13 = arith.addf %10, %12 : vector<1x128xf32>
    %c0_7 = arith.constant 0 : index
    %c0_8 = arith.constant 0 : index
    %c0_9 = arith.constant 0 : index
    %14 = vector.load %arg4[%c0_7, %c0_8, %c0_9] : memref<3x1x128xf32, #tpu.memory_space<vmem>>, vector<1x1x128xf32>
    %15 = vector.shape_cast %14 : vector<1x1x128xf32> to vector<1x128xf32>
    %16 = vector.shape_cast %13 : vector<1x128xf32> to vector<1x1x128xf32>
    tpu.vector_store %arg4[%c0_7, %c0_8, %c0_9], %16 {strides = array<i32>} : memref<3x1x128xf32, #tpu.memory_space<vmem>>, vector<1x1x128xf32>,
    %c2 = arith.constant 2 : index
    %17 = memref.load %arg2[%c2] : memref<6xf32, #tpu.memory_space<smem>>
    %18 = vector.broadcast %17 : f32 to vector<1x128xf32>
    %19 = arith.mulf %18, %1 : vector<1x128xf32>
    %c3 = arith.constant 3 : index
    %20 = memref.load %arg2[%c3] : memref<6xf32, #tpu.memory_space<smem>>
    %21 = vector.broadcast %20 : f32 to vector<1x128xf32>
    %22 = arith.mulf %21, %3 : vector<1x128xf32>
    %23 = arith.addf %19, %22 : vector<1x128xf32>
    %c1_10 = arith.constant 1 : index
    %24 = memref.load %arg3[%c1_10] : memref<3xf32, #tpu.memory_space<smem>>
    %25 = vector.broadcast %24 : f32 to vector<1x128xf32>
    %26 = arith.addf %23, %25 : vector<1x128xf32>
    %c1_11 = arith.constant 1 : index
    %c0_12 = arith.constant 0 : index
    %c0_13 = arith.constant 0 : index
    %27 = vector.load %arg4[%c1_11, %c0_12, %c0_13] : memref<3x1x128xf32, #tpu.memory_space<vmem>>, vector<1x1x128xf32>
    %28 = vector.shape_cast %27 : vector<1x1x128xf32> to vector<1x128xf32>
    %29 = vector.shape_cast %26 : vector<1x128xf32> to vector<1x1x128xf32>
    tpu.vector_store %arg4[%c1_11, %c0_12, %c0_13], %29 {strides = array<i32>} : memref<3x1x128xf32, #tpu.memory_space<vmem>>, vector<1x1x128xf32>,
    %c4 = arith.constant 4 : index
    %30 = memref.load %arg2[%c4] : memref<6xf32, #tpu.memory_space<smem>>
    %31 = vector.broadcast %30 : f32 to vector<1x128xf32>
    %32 = arith.mulf %31, %1 : vector<1x128xf32>
    %c5 = arith.constant 5 : index
    %33 = memref.load %arg2[%c5] : memref<6xf32, #tpu.memory_space<smem>>
    %34 = vector.broadcast %33 : f32 to vector<1x128xf32>
    %35 = arith.mulf %34, %3 : vector<1x128xf32>
    %36 = arith.addf %32, %35 : vector<1x128xf32>
    %c2_14 = arith.constant 2 : index
    %37 = memref.load %arg3[%c2_14] : memref<3xf32, #tpu.memory_space<smem>>
    %38 = vector.broadcast %37 : f32 to vector<1x128xf32>
    %39 = arith.addf %36, %38 : vector<1x128xf32>
    %c2_15 = arith.constant 2 : index
    %c0_16 = arith.constant 0 : index
    %c0_17 = arith.constant 0 : index
    %40 = vector.load %arg4[%c2_15, %c0_16, %c0_17] : memref<3x1x128xf32, #tpu.memory_space<vmem>>, vector<1x1x128xf32>
    %41 = vector.shape_cast %40 : vector<1x1x128xf32> to vector<1x128xf32>
    %42 = vector.shape_cast %39 : vector<1x128xf32> to vector<1x1x128xf32>
    tpu.vector_store %arg4[%c2_15, %c0_16, %c0_17], %42 {strides = array<i32>} : memref<3x1x128xf32, #tpu.memory_space<vmem>>, vector<1x1x128xf32>,
    return
  }
  func.func @transform_0(%arg0: i32) -> (i32, i32, i32) {
    %c0_i32 = arith.constant 0 : i32
    %c0_i32_0 = arith.constant 0 : i32
    %c0_i32_1 = arith.constant 0 : i32
    return %c0_i32, %arg0, %c0_i32_0 : i32, i32, i32
  }
  func.func @transform_1(%arg0: i32) -> i32 {
    %c0_i32 = arith.constant 0 : i32
    %c0_i32_0 = arith.constant 0 : i32
    return %c0_i32 : i32
  }
  func.func @transform_2(%arg0: i32) -> i32 {
    %c0_i32 = arith.constant 0 : i32
    %c0_i32_0 = arith.constant 0 : i32
    return %c0_i32 : i32
  }
  func.func @transform_3(%arg0: i32) -> (i32, i32, i32) {
    %c0_i32 = arith.constant 0 : i32
    %c0_i32_0 = arith.constant 0 : i32
    %c0_i32_1 = arith.constant 0 : i32
    return %c0_i32, %arg0, %c0_i32_0 : i32, i32, i32
  }
}

</mosaic_0001>

<bundles_post_ra>
// kernel: emittion_forward.1
= control target key start
LH: loop header
LB: loop body
LE: loop exit
PB: predicated region body
PF: predicated region fallthrough
CT: control target
= control target key end

     0   :  { %8 = vsyncpa [#allocation3], 0  ;;  %s166_s0 = inlined_call_operand.vmem [shape: f32[2,1,128], index: 0, kind: input, shape index: {}]   ;;  %s167_s1 = inlined_call_operand.vmem [shape: f32[6], index: 1, kind: input, shape index: {}]   ;;  %s168_s2 = inlined_call_operand.vmem [shape: f32[3], index: 2, kind: input, shape index: {}]   ;;  %s169_s3 = inlined_call_operand.vmem [shape: f32[3,1,128], index: 3, kind: output, shape index: {}]  }
   0x1   :  { %s17_s14 = sshll.u32 %s167_s1, 4  ;;  %s18_s14 = int_to_ptr.vmem [resolvable:$true] %s17_s14 }
   0x2   :  { %9 = vsyncpa [#allocation5], 0  ;;  %s26_s17 = sshll.u32 %s168_s2, 4  ;;  %s123_s18 = smov [#allocation2]   ;;  %s27_s17 = int_to_ptr.vmem [resolvable:$true] %s26_s17 }
   0x3   :  { %20 = dma.vmem_to_smem %s18_s14, 16, %s123_s18, [#allocation3]  }
   0x4   :  { %s124_s19 = smov [#allocation4]  }
   0x5   :  { %29 = dma.vmem_to_smem %s27_s17, 16, %s124_s19, [#allocation5]  }
   0x6   :  { %119 = dma.done.wait [#allocation3], 16  }
   0x7   :  { %120 = vsyncadd [#allocation3], 4294967280 }
   0x8   :  { %121 = dma.done.wait [#allocation5], 16  }
   0x9   :  { %122 = vsyncadd [#allocation5], 4294967280 }
   0xa   :  { %38 = sfence }
   0xb   :  { %s42_s20 = sld [smem:[#allocation2]]  ;;  %v39_v0 = vld [vmem:[%s166_s0] sm:$0x1]  ;;  %v83_v1 = vld [vmem:[%s166_s0 + $0x1] sm:$0x1] }
   0xc   :  { %s84_s21 = sld [smem:[#allocation2 + $0x1]] }
   0xd   :  { %s49_s22 = sld [smem:[#allocation4]] }
   0xe   :  { %s85_s1 = sld [smem:[#allocation2 + $0x2]] }
   0xf   :  { %s86_s25 = sld [smem:[#allocation2 + $0x3]] }
  0x10   :  { %s87_s27 = sld [smem:[#allocation4 + $0x1]] }
  0x11   :  { %v43_v2 = vstv %s42_s20  ;;  %s89_s28 = sld [smem:[#allocation2 + $0x4]] }
  0x12   :  { %v44_v3 = vmul.f32 %v43_v2, %v39_v0  ;;  %v46_v4 = vstv %s84_s21  ;;  %s90_s29 = sld [smem:[#allocation2 + $0x5]] }
  0x13   :  { %v47_v5 = vmul.f32 %v83_v1, %v46_v4  ;;  %s91_s30 = sld [smem:[#allocation4 + $0x2]]  ;;  %v50_v6 = vstv %s49_s22 }
  0x14   :  { %v54_v7 = vstv %s85_s1 }
  0x15   :  { %v48_v8 = vadd.f32 %v47_v5, %v44_v3  ;;  %v55_v9 = vmul.f32 %v54_v7, %v39_v0  ;;  %v57_v10 = vstv %s86_s25 }
  0x16   :  { %v58_v11 = vmul.f32 %v83_v1, %v57_v10  ;;  %v61_v13 = vstv %s87_s27 }
  0x17   :  { %v51_v12 = vadd.f32 %v50_v6, %v48_v8  ;;  %v66_v14 = vstv %s89_s28 }
  0x18   :  { %v59_v15 = vadd.f32 %v58_v11, %v55_v9  ;;  %v67_v16 = vmul.f32 %v66_v14, %v39_v0  ;;  %v69_v17 = vstv %s90_s29 }
  0x19   :  { %52 = vst [vmem:[%s169_s3] sm:$0x1] %v51_v12  ;;  %v70_v18 = vmul.f32 %v83_v1, %v69_v17  ;;  %v73_v20 = vstv %s91_s30 }
  0x1a   :  { %v62_v19 = vadd.f32 %v61_v13, %v59_v15 }
  0x1b   :  { %v71_v21 = vadd.f32 %v70_v18, %v67_v16 }
  0x1c   :  { %88 = vst [vmem:[%s169_s3 + $0x1] sm:$0x1] %v62_v19 }
  0x1d   :  { %v74_v22 = vadd.f32 %v73_v20, %v71_v21 }
  0x1f   :  { %92 = vst [vmem:[%s169_s3 + $0x2] sm:$0x1] %v74_v22 }
  0x20   :  { %81 = vsyncpa [#allocation3], 1 }
  0x21   :  { %82 = vsyncpa [#allocation5], 1 }

</bundles_post_ra>
